<compile_context>
chip_gen: v7x
topology: tpu7x:2x2x1
jax: 0.10.0
libtpu: 0.0.40
codegen_flags: <defaults>
</compile_context>

<pallas_src>
import functools

import jax
import jax.numpy as jnp
from jax import lax
from jax.experimental import pallas as pl
from jax.experimental.pallas import tpu as pltpu


def _round_up(x: int, m: int) -> int:
    return ((x + m - 1) // m) * m


def _csdf_kernel(p_ref, q_ref, o_ref, acc_ref, *, sphere_radius, chunk):
    """Grid: (query tiles [parallel], cloud super-blocks [arbitrary reduction]).

    p_ref:   (5, n_block)  rows [-2*px, -2*py, -2*pz, |p|^2, 1]  (points on lanes)
    q_ref:   (5, tm)       rows [qx, qy, qz, 1, |q|^2]           (queries on lanes)
    o_ref:   (1, tm)       per-query distance (lane-dense output)
    acc_ref: (8, tm)       running per-sublane-group min of squared distances
    """
    j = pl.program_id(1)

    @pl.when(j == 0)
    def _():
        acc_ref[...] = jnp.full(acc_ref.shape, jnp.inf, acc_ref.dtype)

    n_block = p_ref.shape[1]
    n_chunks = n_block // chunk

    q = q_ref[...]  # hoisted: loaded once per grid step

    def process_chunk(start):
        p_chunk = p_ref[:, pl.ds(start, chunk)]                     # (5, chunk)
        # One MXU matmul per chunk (lhs-transposed contraction over the 5-wide
        # augmented axis): d2[n, m] = |p_n|^2 + |q_m|^2 - 2 p_n . q_m
        d2 = lax.dot_general(
            p_chunk, q,
            dimension_numbers=(((0,), (0,)), ((), ())),
            preferred_element_type=jnp.float32)                     # (chunk, tm)
        # Log-tree of full-vreg VPU mins down to 8 sublanes; no per-chunk
        # cross-sublane (XLU) reduce.
        rows, m = chunk, d2
        while rows > 8:
            rows //= 2
            m = jnp.minimum(m[:rows], m[rows:])
        acc_ref[...] = jnp.minimum(acc_ref[...], m)

    if n_chunks <= 4:
        # Small clouds: static unroll (full LLO scheduler visibility).
        for c in range(n_chunks):
            process_chunk(c * chunk)
    else:
        @pl.loop(0, n_chunks)
        def _(c):
            process_chunk(pl.multiple_of(c * chunk, chunk))

    @pl.when(j == pl.num_programs(1) - 1)
    def _():
        # Single 8->1 sublane reduce + sqrt + radius, once per query tile.
        d2min = jnp.min(acc_ref[...], axis=0, keepdims=True)        # (1, tm)
        o_ref[...] = jnp.sqrt(jnp.maximum(d2min, 0.0)) - sphere_radius


def pointcloud_csdf(x, pcd, sphere_radius=0.02, *,
                    tm_max=512, chunk=256, n_resident_max=32768):
    """x: (B, P, 3) query points, pcd: (N, 3) point cloud -> (B,) C-SDF values."""
    B, P, _ = x.shape
    N = pcd.shape[0]
    M = B * P

    q = x.reshape(M, 3).astype(jnp.float32)
    pcd_f = pcd.astype(jnp.float32)

    # --- Query tiling: queries live on lanes; tm multiple of 128, <= tm_max,
    # and at least 2 tiles whenever M > 128 so v7x's two TensorCores both work.
    m_pad128 = _round_up(M, 128)
    if m_pad128 <= 128:
        tm = 128
    else:
        tm = min(tm_max, max(128, _round_up(-(-m_pad128 // 2), 128)))
    m_pad = _round_up(M, tm)
    m_tiles = m_pad // tm

    # --- Point-cloud blocking: whole cloud resident (single super-block) up to
    # n_resident_max points; larger clouds stream lane-dense super-blocks on an
    # "arbitrary" reduction axis.  Everything is a multiple of `chunk`.
    n_ru = _round_up(N, chunk)
    n_block = min(n_resident_max, n_ru)
    n_blocks = -(-n_ru // n_block)
    n_pad = n_blocks * n_block

    # Pad queries with zeros (sliced off afterwards); pad the point cloud by
    # repeating its last real point (never changes the min, no huge sentinels).
    if m_pad != M:
        q = jnp.concatenate([q, jnp.zeros((m_pad - M, 3), jnp.float32)], axis=0)
    if n_pad != N:
        pcd_f = jnp.concatenate(
            [pcd_f, jnp.broadcast_to(pcd_f[-1:], (n_pad - N, 3))], axis=0)

    # Augmented operands, both stored TRANSPOSED (lane-dense) so one MXU matmul
    # per chunk produces the full squared distance.  Kept in f32 on purpose
    # (expanded quadratic cancels catastrophically in bf16).
    psq = jnp.sum(pcd_f * pcd_f, axis=1)                              # (n_pad,)
    p_aug = jnp.concatenate(
        [(-2.0 * pcd_f).T,                                            # (3, n_pad)
         psq[None, :],
         jnp.ones((1, n_pad), jnp.float32)], axis=0)                  # (5, n_pad)

    qsq = jnp.sum(q * q, axis=1)                                      # (m_pad,)
    q_aug = jnp.concatenate(
        [q.T,                                                         # (3, m_pad)
         jnp.ones((1, m_pad), jnp.float32),
         qsq[None, :]], axis=0)                                       # (5, m_pad)

    kernel = functools.partial(_csdf_kernel,
                               sphere_radius=float(sphere_radius),
                               chunk=chunk)

    # Explicit VMEM budget (safe on v5e/v6e/v7x): resident cloud is lane-dense
    # so even 32K points is only ~1 MiB per buffer.
    vmem_est = (2 * 8 * n_block * 4        # cloud block (sublane-padded 5->8), 2 bufs
                + 2 * 8 * tm * 4           # query block
                + 2 * 8 * tm * 4           # output block
                + 8 * tm * 4               # accumulator scratch
                + 2 * chunk * tm * 4)      # d2 intermediate headroom
    vmem_limit = int(min(max(4 * vmem_est, 32 << 20), 48 << 20))

    per_query = pl.pallas_call(
        kernel,
        out_shape=jax.ShapeDtypeStruct((1, m_pad), jnp.float32),
        grid_spec=pltpu.PrefetchScalarGridSpec(
            num_scalar_prefetch=0,
            grid=(m_tiles, n_blocks),
            in_specs=[
                # Point cloud (5, n_block): block index constant in i -> stays
                # VMEM-resident; single contiguous lane-dense DMA per block.
                pl.BlockSpec((5, n_block), lambda i, j: (0, j)),
                # Queries (5, tm): re-fetched only when the query tile changes.
                pl.BlockSpec((5, tm), lambda i, j: (0, i)),
            ],
            # Lane-dense output: (1, tm) blocks -> full-width stores.
            out_specs=pl.BlockSpec((1, tm), lambda i, j: (0, i)),
            scratch_shapes=[pltpu.VMEM((8, tm), jnp.float32)],
        ),
        compiler_params=pltpu.CompilerParams(
            dimension_semantics=("parallel", "arbitrary"),
            vmem_limit_bytes=vmem_limit),
    )(p_aug, q_aug)

    # Tiny glue: per-batch min over num_points (dist is batch_size x num_points).
    dist = per_query[0, :M].reshape(B, P)
    return jnp.min(dist, axis=1)


def _reference(x, pcd, sphere_radius):
    # Pure-JAX brute-force reference (matches the PyTorch ChamferDistance path).
    diff = x[:, :, None, :] - pcd[None, None, :, :]            # (B, P, N, 3)
    d2 = jnp.sum(diff * diff, axis=-1)                         # (B, P, N)
    dist = jnp.sqrt(jnp.min(d2, axis=-1)) - sphere_radius      # (B, P)
    return jnp.min(dist, axis=1)                               # (B,)


if __name__ == "__main__":
    key = jax.random.PRNGKey(0)
    k_pcd, k_x, k_pcd2, k_x2 = jax.random.split(key, 4)

    sphere_radius = 0.02

    # Primary small check (single query tile, single resident chunk).
    batch_size, num_points, n_pcd = 2, 8, 200
    pcd = jax.random.uniform(k_pcd, (n_pcd, 3), jnp.float32,
                             minval=-1.0, maxval=1.0)
    x = jax.random.normal(k_x, (batch_size, num_points, 3), jnp.float32) * 0.5

    csdf = jax.block_until_ready(pointcloud_csdf(x, pcd, sphere_radius))
    ref = _reference(x, pcd, sphere_radius)
    assert csdf.shape == (batch_size,)
    assert jnp.allclose(csdf, ref, atol=1e-3, rtol=1e-3), (csdf, ref)

    # Secondary check: 2 query tiles (both TCs on v7x) and the pl.loop chunk
    # path (N=2500 -> 10 chunks of 256 points inside one resident block).
    b2, p2, n2 = 4, 70, 2500
    pcd2 = jax.random.uniform(k_pcd2, (n2, 3), jnp.float32,
                              minval=-1.0, maxval=1.0)
    x2 = jax.random.normal(k_x2, (b2, p2, 3), jnp.float32) * 0.5
    csdf2 = jax.block_until_ready(pointcloud_csdf(x2, pcd2, sphere_radius))
    ref2 = _reference(x2, pcd2, sphere_radius)
    assert jnp.allclose(csdf2, ref2, atol=1e-3, rtol=1e-3), (csdf2, ref2)

    print("KERNEL_OK")
</pallas_src>

<mosaic_0001>
module attributes {stable_mosaic.version = 11 : i64} {
  func.func @_csdf_kernel(%arg0: i32, %arg1: i32, %arg2: memref<5x256xf32, #tpu.memory_space<vmem>>, %arg3: memref<5x128xf32, #tpu.memory_space<vmem>>, %arg4: memref<1x128xf32, #tpu.memory_space<vmem>>, %arg5: memref<8x128xf32, #tpu.memory_space<vmem>>) attributes {dimension_semantics = [#tpu.dimension_semantics<parallel>, #tpu.dimension_semantics<arbitrary>], iteration_bounds = array<i64: 1, 1>, scalar_prefetch = 0 : i64, scratch_operands = 1 : i64, tpu.core_type = #tpu.core_type<tc>, window_params = [{transform_indices = @transform_0, window_bounds = array<i64: 5, 256>}, {transform_indices = @transform_1, window_bounds = array<i64: 5, 128>}, {transform_indices = @transform_2, window_bounds = array<i64: 1, 128>}]} {
    %c0_i32 = arith.constant 0 : i32
    %0 = arith.cmpi eq, %arg1, %c0_i32 : i32
    %1 = arith.extui %0 : i1 to i32
    %c0_i32_0 = arith.constant 0 : i32
    %2 = arith.cmpi ne, %1, %c0_i32_0 : i32
    scf.if %2 {
      %cst_10 = arith.constant 0x7F800000 : f32
      %27 = vector.broadcast %cst_10 : f32 to vector<8x128xf32>
      %c0_11 = arith.constant 0 : index
      %c0_12 = arith.constant 0 : index
      %28 = vector.load %arg5[%c0_11, %c0_12] : memref<8x128xf32, #tpu.memory_space<vmem>>, vector<8x128xf32>
      tpu.vector_store %arg5[%c0_11, %c0_12], %27 {strides = array<i32>} : memref<8x128xf32, #tpu.memory_space<vmem>>, vector<8x128xf32>,
    } else {
    }
    %c0 = arith.constant 0 : index
    %c0_1 = arith.constant 0 : index
    %3 = vector.load %arg3[%c0, %c0_1] : memref<5x128xf32, #tpu.memory_space<vmem>>, vector<5x128xf32>
    %c0_2 = arith.constant 0 : index
    %c0_3 = arith.constant 0 : index
    %4 = vector.load %arg2[%c0_2, %c0_3] : memref<5x256xf32, #tpu.memory_space<vmem>>, vector<5x256xf32>
    %cst = arith.constant dense<0.000000e+00> : vector<256x128xf32>
    %5 = tpu.matmul %4, %3, %cst {dimension_numbers = #tpu.dot_dimension_numbers<[0], [0], [1], [1], [0, 1, 1, 1], [], []>} : vector<5x256xf32>, vector<5x128xf32>, vector<256x128xf32> -> vector<256x128xf32>
    %6 = vector.extract_strided_slice %5 {offsets = [0, 0], sizes = [128, 128], strides = [1, 1]} : vector<256x128xf32> to vector<128x128xf32>
    %7 = vector.extract_strided_slice %5 {offsets = [128, 0], sizes = [128, 128], strides = [1, 1]} : vector<256x128xf32> to vector<128x128xf32>
    %8 = arith.minimumf %6, %7 : vector<128x128xf32>
    %9 = vector.extract_strided_slice %8 {offsets = [0, 0], sizes = [64, 128], strides = [1, 1]} : vector<128x128xf32> to vector<64x128xf32>
    %10 = vector.extract_strided_slice %8 {offsets = [64, 0], sizes = [64, 128], strides = [1, 1]} : vector<128x128xf32> to vector<64x128xf32>
    %11 = arith.minimumf %9, %10 : vector<64x128xf32>
    %12 = vector.extract_strided_slice %11 {offsets = [0, 0], sizes = [32, 128], strides = [1, 1]} : vector<64x128xf32> to vector<32x128xf32>
    %13 = vector.extract_strided_slice %11 {offsets = [32, 0], sizes = [32, 128], strides = [1, 1]} : vector<64x128xf32> to vector<32x128xf32>
    %14 = arith.minimumf %12, %13 : vector<32x128xf32>
    %15 = vector.extract_strided_slice %14 {offsets = [0, 0], sizes = [16, 128], strides = [1, 1]} : vector<32x128xf32> to vector<16x128xf32>
    %16 = vector.extract_strided_slice %14 {offsets = [16, 0], sizes = [16, 128], strides = [1, 1]} : vector<32x128xf32> to vector<16x128xf32>
    %17 = arith.minimumf %15, %16 : vector<16x128xf32>
    %18 = vector.extract_strided_slice %17 {offsets = [0, 0], sizes = [8, 128], strides = [1, 1]} : vector<16x128xf32> to vector<8x128xf32>
    %19 = vector.extract_strided_slice %17 {offsets = [8, 0], sizes = [8, 128], strides = [1, 1]} : vector<16x128xf32> to vector<8x128xf32>
    %20 = arith.minimumf %18, %19 : vector<8x128xf32>
    %c0_4 = arith.constant 0 : index
    %c0_5 = arith.constant 0 : index
    %21 = vector.load %arg5[%c0_4, %c0_5] : memref<8x128xf32, #tpu.memory_space<vmem>>, vector<8x128xf32>
    %22 = arith.minimumf %21, %20 : vector<8x128xf32>
    %c0_6 = arith.constant 0 : index
    %c0_7 = arith.constant 0 : index
    %23 = vector.load %arg5[%c0_6, %c0_7] : memref<8x128xf32, #tpu.memory_space<vmem>>, vector<8x128xf32>
    tpu.vector_store %arg5[%c0_6, %c0_7], %22 {strides = array<i32>} : memref<8x128xf32, #tpu.memory_space<vmem>>, vector<8x128xf32>,
    %c0_i32_8 = arith.constant 0 : i32
    %24 = arith.cmpi eq, %arg1, %c0_i32_8 : i32
    %25 = arith.extui %24 : i1 to i32
    %c0_i32_9 = arith.constant 0 : i32
    %26 = arith.cmpi ne, %25, %c0_i32_9 : i32
    scf.if %26 {
      %c0_10 = arith.constant 0 : index
      %c0_11 = arith.constant 0 : index
      %27 = vector.load %arg5[%c0_10, %c0_11] : memref<8x128xf32, #tpu.memory_space<vmem>>, vector<8x128xf32>
      %cst_12 = arith.constant dense<0x7F800000> : vector<128xf32>
      %28 = vector.multi_reduction <minimumf>, %27, %cst_12 [0] : vector<8x128xf32> to vector<128xf32>
      %29 = vector.shape_cast %28 : vector<128xf32> to vector<1x128xf32>
      %cst_13 = arith.constant 0.000000e+00 : f32
      %30 = vector.broadcast %cst_13 : f32 to vector<1x128xf32>
      %31 = arith.maximumf %29, %30 : vector<1x128xf32>
      %32 = math.sqrt %31 : vector<1x128xf32>
      %cst_14 = arith.constant 2.000000e-02 : f32
      %33 = vector.broadcast %cst_14 : f32 to vector<1x128xf32>
      %34 = arith.subf %32, %33 : vector<1x128xf32>
      %c0_15 = arith.constant 0 : index
      %c0_16 = arith.constant 0 : index
      %35 = vector.load %arg4[%c0_15, %c0_16] : memref<1x128xf32, #tpu.memory_space<vmem>>, vector<1x128xf32>
      tpu.vector_store %arg4[%c0_15, %c0_16], %34 {strides = array<i32>} : memref<1x128xf32, #tpu.memory_space<vmem>>, vector<1x128xf32>,
    } else {
    }
    return
  }
  func.func @transform_0(%arg0: i32, %arg1: i32) -> (i32, i32) {
    %c0_i32 = arith.constant 0 : i32
    %c0_i32_0 = arith.constant 0 : i32
    return %c0_i32, %arg1 : i32, i32
  }
  func.func @transform_1(%arg0: i32, %arg1: i32) -> (i32, i32) {
    %c0_i32 = arith.constant 0 : i32
    %c0_i32_0 = arith.constant 0 : i32
    return %c0_i32, %arg0 : i32, i32
  }
  func.func @transform_2(%arg0: i32, %arg1: i32) -> (i32, i32) {
    %c0_i32 = arith.constant 0 : i32
    %c0_i32_0 = arith.constant 0 : i32
    return %c0_i32, %arg0 : i32, i32
  }
}

</mosaic_0001>

<bundles_post_ra>
// kernel: tpu_custom_call.1
= control target key start
LH: loop header
LB: loop body
LE: loop exit
PB: predicated region body
PF: predicated region fallthrough
CT: control target
= control target key end

     0   :  { %7 = vsyncpa [#allocation4], 0  ;;  %s787_s0 = inlined_call_operand.hbm [shape: f32[5,256], index: 0, kind: input, shape index: {}]   ;;  %s788_s1 = inlined_call_operand.hbm [shape: f32[5,128], index: 1, kind: input, shape index: {}]   ;;  %s789_s2 = inlined_call_operand.hbm [shape: f32[1,128], index: 2, kind: output, shape index: {}]  }
   0x1   :  { %8 = vsyncpa [#allocation7], 0 }
   0x2   :  { %9 = vsyncpa [#allocation5], 0  ;;  %s701_s9 = smov [#allocation3]   ;;  %s702_s11 = smov [#allocation6]  }
   0x3   :  { %s16_s10 = sshll.u32 %s701_s9, 4  ;;  %s26_s12 = sshll.u32 %s702_s11, 4  ;;  %s17_s10 = int_to_ptr.vmem [resolvable:$true] %s16_s10  ;;  %s27_s12 = int_to_ptr.vmem [resolvable:$true] %s26_s12 }
   0x4   :  { %s629_s15 = scalar_lea.hbm %s787_s0, 256 }
   0x5   :  { %p630_p0 = scmp.ne.s32.totalorder %s787_s0, %s629_s15  ;;  %p633_p1 = scmp.lt.u32.totalorder %s629_s15, %s787_s0 }
   0x7   :  { %p635_p2 = pnand %p633_p1, %p630_p0 }
   0x9   :  { %638 = shalt.err (!%p635_p2)
}
   0xa   :  { %s639_s20 = scalar_lea.vmem %s17_s10, 256  ;;  %p644_p4 = scmp.lt.s32.totalorder %s17_s10, %s17_s10 }
   0xb   :  { %p640_p3 = scmp.ne.s32.totalorder %s17_s10, %s639_s20  ;;  %p645_p5 = scmp.lt.s32.totalorder %s639_s20, %s639_s20 }
   0xd   :  { %p646_p6 = por %p645_p5, %p644_p4 }
   0xf   :  { %p647_p7 = pnand %p646_p6, %p640_p3 }
  0x11   :  { %650 = shalt.err (!%p647_p7)
}
  0x12   :  { %19 = dma.hbm_to_vmem [thread:$0]  %s787_s0, 256, %s17_s10, [#allocation4]  }
  0x13   :  { %s651_s25 = scalar_lea.hbm %s788_s1, 128 }
  0x14   :  { %p652_p8 = scmp.ne.s32.totalorder %s788_s1, %s651_s25  ;;  %p655_p9 = scmp.lt.u32.totalorder %s651_s25, %s788_s1 }
  0x16   :  { %p657_p10 = pnand %p655_p9, %p652_p8 }
  0x18   :  { %660 = shalt.err (!%p657_p10)
}
  0x19   :  { %s661_s30 = scalar_lea.vmem %s27_s12, 128  ;;  %p666_p12 = scmp.lt.s32.totalorder %s27_s12, %s27_s12 }
  0x1a   :  { %p662_p11 = scmp.ne.s32.totalorder %s27_s12, %s661_s30  ;;  %p667_p13 = scmp.lt.s32.totalorder %s661_s30, %s661_s30 }
  0x1c   :  { %p668_p0 = por %p667_p13, %p666_p12 }
  0x1e   :  { %p669_p1 = pnand %p668_p0, %p662_p11 }
  0x20   :  { %672 = shalt.err (!%p669_p1)
}
  0x21   :  { %29 = dma.hbm_to_vmem [thread:$0]  %s788_s1, 128, %s27_s12, [#allocation7]  }
  0x22   :  { %695 = dma.done.wait [#allocation4], 256  }
  0x23   :  { %696 = vsyncadd [#allocation4], 4294967040 }
  0x24   :  { %697 = dma.done.wait [#allocation7], 128  }
  0x25   :  { %698 = vsyncadd [#allocation7], 4294967168  ;;  %v42_v0 = vld [vmem:[#allocation3] sm:$0x1f]  ;;  %v41_v1 = vld [vmem:[#allocation6] sm:$0x1f] }
  0x26   :  { %44 = vxpose.xlu0.b32.start.end [1/1] (short) %v42_v0, 128  ;;  %vm205_vm0 = vcmask 1044480   ;;  %v43_v2 = vld [vmem:[#allocation3 + $0x8] sm:$0x1f]  ;;  %vm108_vm1 = vcmask 39936   ;;  %s703_s1 = smov [#allocation8]  }
  0x27   :  { %571 = vmatprep.subr.msk.mxu0 %vm205_vm0, %v41_v1  ;;  %621 = vmatprep.subr.msk.mxu1 %vm205_vm0, %v41_v1  ;;  %s494_s4 = sshll.u32 %s703_s1, 4  ;;  %s495_s4 = int_to_ptr.vmem [resolvable:$true] %s494_s4 }
  0x28   :  { %572 = vmatpush3.msk.msra.mxu0 %vm205_vm0, %v41_v1  ;;  %622 = vmatpush3.msk.msra.mxu1 %vm205_vm0, %v41_v1  ;;  %s673_s5 = scalar_lea.vmem %s495_s4, 16  ;;  %s677_s6 = scalar_lea.vmem %s495_s4, 32 }
  0x29   :  { %p674_p2 = scmp.ne.s32.totalorder %s495_s4, %s673_s5  ;;  %p678_p3 = scmp.lt.s32.totalorder %s495_s4, %s495_s4 }
  0x2a   :  { %p679_p4 = scmp.lt.s32.totalorder %s677_s6, %s673_s5 }
  0x2c   :  { %p680_p5 = por %p679_p4, %p678_p3 }
  0x2e   :  { %p681_p6 = pnand %p680_p5, %p674_p2 }
  0x63   :  { %76 = vxpose.xlu0.b32.start.end [1/1] (short) %v43_v2, 128 }
  0xa6   :  { %v60_v3 = vpop.trf.xlu0 }
  0xa7   :  { %573 = vmatprep.mubr.msk.f32.mxu0 %vm108_vm1, %v60_v3 }
  0xaa   :  { %v61_v4 = vpop.trf.xlu0 }
  0xab   :  { %574 = vmatmul.mubr.msk.f32.vlgmr.msra.gmra.mrb[0].mxu0 %vm108_vm1, %v61_v4 }
  0xae   :  { %v62_v5 = vpop.trf.xlu0 }
  0xaf   :  { %576 = vmatprep.mubr.msk.f32.mxu0 %vm108_vm1, %v62_v5 }
  0xb2   :  { %v63_v6 = vpop.trf.xlu0 }
  0xb3   :  { %577 = vmatmul.mubr.msk.f32.gmra.mrb[2].mxu0 %vm108_vm1, %v63_v6 }
  0xb6   :  { %v64_v7 = vpop.trf.xlu0 }
  0xb7   :  { %579 = vmatprep.mubr.msk.f32.mxu0 %vm108_vm1, %v64_v7 }
  0xba   :  { %v65_v8 = vpop.trf.xlu0 }
  0xbb   :  { %580 = vmatmul.mubr.msk.f32.gmra.mrb[4].mxu0 %vm108_vm1, %v65_v8 }
  0xbe   :  { %v66_v9 = vpop.trf.xlu0 }
  0xbf   :  { %582 = vmatprep.mubr.msk.f32.mxu0 %vm108_vm1, %v66_v9 }
  0xc2   :  { %v67_v10 = vpop.trf.xlu0 }
  0xc3   :  { %583 = vmatmul.mubr.msk.f32.gmra.mrb[6].mxu0 %vm108_vm1, %v67_v10 }
  0xc6   :  { %v68_v11 = vpop.trf.xlu0 }
  0xc7   :  { %585 = vmatprep.mubr.msk.f32.mxu0 %vm108_vm1, %v68_v11 }
  0xca   :  { %v69_v12 = vpop.trf.xlu0 }
  0xcb   :  { %586 = vmatmul.mubr.msk.f32.gmra.mrb[8].mxu0 %vm108_vm1, %v69_v12 }
  0xce   :  { %v70_v13 = vpop.trf.xlu0 }
  0xcf   :  { %588 = vmatprep.mubr.msk.f32.mxu0 %vm108_vm1, %v70_v13 }
  0xd2   :  { %v71_v14 = vpop.trf.xlu0 }
  0xd3   :  { %589 = vmatmul.mubr.msk.f32.gmra.mrb[10].mxu0 %vm108_vm1, %v71_v14 }
  0xd6   :  { %v72_v15 = vpop.trf.xlu0 }
  0xd7   :  { %591 = vmatprep.mubr.msk.f32.mxu0 %vm108_vm1, %v72_v15 }
  0xda   :  { %v73_v16 = vpop.trf.xlu0 }
  0xdb   :  { %592 = vmatmul.mubr.msk.f32.gmra.mrb[12].mxu0 %vm108_vm1, %v73_v16 }
  0xde   :  { %v74_v17 = vpop.trf.xlu0 }
  0xdf   :  { %594 = vmatprep.mubr.msk.f32.mxu0 %vm108_vm1, %v74_v17 }
  0xe2   :  { %v75_v18 = vpop.trf.xlu0 }
  0xe3   :  { %595 = vmatmul.mubr.msk.f32.gmra.mrb[14].mxu0 %vm108_vm1, %v75_v18 }
  0xe6   :  { %v92_v19 = vpop.trf.xlu0 }
  0xe7   :  { %597 = vmatprep.mubr.msk.f32.mxu1 %vm108_vm1, %v92_v19 }
  0xea   :  { %v93_v20 = vpop.trf.xlu0 }
  0xeb   :  { %598 = vmatmul.mubr.msk.f32.vlgmr.msra.gmra.mrb[0].mxu1 %vm108_vm1, %v93_v20 }
  0xee   :  { %v94_v21 = vpop.trf.xlu0 }
  0xef   :  { %600 = vmatprep.mubr.msk.f32.mxu1 %vm108_vm1, %v94_v21 }
  0xf2   :  { %v95_v22 = vpop.trf.xlu0 }
  0xf3   :  { %601 = vmatmul.mubr.msk.f32.gmra.mrb[2].mxu1 %vm108_vm1, %v95_v22 }
  0xf6   :  { %v96_v23 = vpop.trf.xlu0 }
  0xf7   :  { %603 = vmatprep.mubr.msk.f32.mxu1 %vm108_vm1, %v96_v23 }
  0xfa   :  { %v97_v24 = vpop.trf.xlu0 }
  0xfb   :  { %604 = vmatmul.mubr.msk.f32.gmra.mrb[4].mxu1 %vm108_vm1, %v97_v24 }
  0xfe   :  { %v98_v25 = vpop.trf.xlu0 }
  0xff   :  { %606 = vmatprep.mubr.msk.f32.mxu1 %vm108_vm1, %v98_v25 }
 0x102   :  { %v99_v26 = vpop.trf.xlu0 }
 0x103   :  { %607 = vmatmul.mubr.msk.f32.gmra.mrb[6].mxu1 %vm108_vm1, %v99_v26 }
 0x106   :  { %v100_v27 = vpop.trf.xlu0 }
 0x107   :  { %609 = vmatprep.mubr.msk.f32.mxu1 %vm108_vm1, %v100_v27 }
 0x10a   :  { %v101_v28 = vpop.trf.xlu0 }
 0x10b   :  { %610 = vmatmul.mubr.msk.f32.gmra.mrb[8].mxu1 %vm108_vm1, %v101_v28 }
 0x10e   :  { %v102_v29 = vpop.trf.xlu0 }
 0x10f   :  { %612 = vmatprep.mubr.msk.f32.mxu1 %vm108_vm1, %v102_v29 }
 0x112   :  { %v103_v30 = vpop.trf.xlu0 }
 0x113   :  { %613 = vmatmul.mubr.msk.f32.gmra.mrb[10].mxu1 %vm108_vm1, %v103_v30 }
 0x116   :  { %v104_v31 = vpop.trf.xlu0 }
 0x117   :  { %615 = vmatprep.mubr.msk.f32.mxu1 %vm108_vm1, %v104_v31 }
 0x11a   :  { %v105_v32 = vpop.trf.xlu0 }
 0x11b   :  { %616 = vmatmul.mubr.msk.f32.gmra.mrb[12].mxu1 %vm108_vm1, %v105_v32 }
 0x11e   :  { %v106_v33 = vpop.trf.xlu0 }
 0x11f   :  { %618 = vmatprep.mubr.msk.f32.mxu1 %vm108_vm1, %v106_v33 }
 0x122   :  { %v107_v34 = vpop.trf.xlu0 }
 0x123   :  { %619 = vmatmul.mubr.msk.f32.gmra.mrb[14].mxu1 %vm108_vm1, %v107_v34 }
 0x17e   :  { %v575_v35 = vpop.f32.mrb[0].mxu0 }
 0x17f   :  { %v275_v36 = vpop.f32.mrb[1].mxu0 }
 0x186   :  { %v578_v37 = vpop.f32.mrb[2].mxu0 }
 0x187   :  { %v285_v38 = vpop.f32.mrb[3].mxu0 }
 0x18e   :  { %v581_v39 = vpop.f32.mrb[4].mxu0 }
 0x18f   :  { %v295_v40 = vpop.f32.mrb[5].mxu0 }
 0x196   :  { %v584_v41 = vpop.f32.mrb[6].mxu0 }
 0x197   :  { %v305_v42 = vpop.f32.mrb[7].mxu0 }
 0x19e   :  { %v587_v43 = vpop.f32.mrb[8].mxu0 }
 0x19f   :  { %v315_v44 = vpop.f32.mrb[9].mxu0 }
 0x1a6   :  { %v590_v45 = vpop.f32.mrb[10].mxu0 }
 0x1a7   :  { %v325_v46 = vpop.f32.mrb[11].mxu0 }
 0x1ae   :  { %v593_v47 = vpop.f32.mrb[12].mxu0 }
 0x1af   :  { %v335_v48 = vpop.f32.mrb[13].mxu0 }
 0x1b6   :  { %v596_v49 = vpop.f32.mrb[14].mxu0 }
 0x1b7   :  { %v345_v50 = vpop.f32.mrb[15].mxu0 }
 0x1be   :  { %v599_v51 = vpop.f32.mrb[0].mxu1 }
 0x1bf   :  { %v435_v52 = vmin.f32 %v575_v35, %v599_v51  ;;  %v355_v53 = vpop.f32.mrb[1].mxu1 }
 0x1c0   :  { %v434_v54 = vmin.f32 %v275_v36, %v355_v53 }
 0x1c6   :  { %v602_v55 = vpop.f32.mrb[2].mxu1 }
 0x1c7   :  { %v437_v56 = vmin.f32 %v578_v37, %v602_v55  ;;  %v365_v57 = vpop.f32.mrb[3].mxu1 }
 0x1c8   :  { %v436_v58 = vmin.f32 %v285_v38, %v365_v57 }
 0x1ce   :  { %v605_v59 = vpop.f32.mrb[4].mxu1 }
 0x1cf   :  { %v439_v60 = vmin.f32 %v581_v39, %v605_v59  ;;  %v375_v61 = vpop.f32.mrb[5].mxu1 }
 0x1d0   :  { %v438_v62 = vmin.f32 %v295_v40, %v375_v61 }
 0x1d6   :  { %v608_v63 = vpop.f32.mrb[6].mxu1 }
 0x1d7   :  { %v441_v0 = vmin.f32 %v584_v41, %v608_v63  ;;  %v385_v1 = vpop.f32.mrb[7].mxu1 }
 0x1d8   :  { %v440_v2 = vmin.f32 %v305_v42, %v385_v1 }
 0x1de   :  { %v611_v3 = vpop.f32.mrb[8].mxu1 }
 0x1df   :  { %v443_v4 = vmin.f32 %v587_v43, %v611_v3  ;;  %v395_v5 = vpop.f32.mrb[9].mxu1 }
 0x1e0   :  { %v442_v6 = vmin.f32 %v315_v44, %v395_v5 }
 0x1e1   :  { %v451_v7 = vmin.f32 %v435_v52, %v443_v4 }
 0x1e2   :  { %v450_v8 = vmin.f32 %v434_v54, %v442_v6 }
 0x1e6   :  { %v614_v9 = vpop.f32.mrb[10].mxu1 }
 0x1e7   :  { %v445_v10 = vmin.f32 %v590_v45, %v614_v9  ;;  %v405_v11 = vpop.f32.mrb[11].mxu1 }
 0x1e8   :  { %v444_v12 = vmin.f32 %v325_v46, %v405_v11 }
 0x1e9   :  { %v453_v13 = vmin.f32 %v437_v56, %v445_v10 }
 0x1ea   :  { %v452_v14 = vmin.f32 %v436_v58, %v444_v12 }
 0x1ee   :  { %v617_v15 = vpop.f32.mrb[12].mxu1 }
 0x1ef   :  { %v447_v16 = vmin.f32 %v593_v47, %v617_v15  ;;  %v415_v17 = vpop.f32.mrb[13].mxu1 }
 0x1f0   :  { %v446_v18 = vmin.f32 %v335_v48, %v415_v17 }
 0x1f1   :  { %v455_v19 = vmin.f32 %v439_v60, %v447_v16 }
 0x1f2   :  { %v454_v20 = vmin.f32 %v438_v62, %v446_v18 }
 0x1f3   :  { %v459_v21 = vmin.f32 %v451_v7, %v455_v19 }
 0x1f4   :  { %v458_v22 = vmin.f32 %v450_v8, %v454_v20 }
 0x1f6   :  { %v620_v23 = vpop.f32.mrb[14].mxu1 }
 0x1f7   :  { %v449_v24 = vmin.f32 %v596_v49, %v620_v23  ;;  %v425_v25 = vpop.f32.mrb[15].mxu1 }
 0x1f8   :  { %v448_v26 = vmin.f32 %v345_v50, %v425_v25 }
 0x1f9   :  { %v457_v27 = vmin.f32 %v441_v0, %v449_v24 }
 0x1fa   :  { %v456_v28 = vmin.f32 %v440_v2, %v448_v26 }
 0x1fb   :  { %v461_v29 = vmin.f32 %v453_v13, %v457_v27 }
 0x1fc   :  { %v460_v30 = vmin.f32 %v452_v14, %v456_v28 }
 0x1fd   :  { %v463_v31 = vmin.f32 %v459_v21, %v461_v29 }
 0x1fe   :  { %v462_v32 = vmin.f32 %v458_v22, %v460_v30 }
 0x200   :  { %v464_v33 = vmin.f32 %v462_v32, %v463_v31 }
 0x202   :  { %v472_v34 = vrot.slane %v464_v33, 4 }
 0x204   :  { %v473_v35 = vmin.f32 %v464_v33, %v472_v34 }
 0x206   :  { %v474_v36 = vrot.slane %v473_v35, 2 }
 0x208   :  { %v475_v37 = vmin.f32 %v473_v35, %v474_v36 }
 0x20a   :  { %v476_v38 = vrot.slane %v475_v37, 1 }
 0x20c   :  { %v477_v39 = vmin.f32 %v475_v37, %v476_v38 }
 0x20e   :  { %v478_v40 = vmax.f32 %v477_v39, 0.0 }
 0x210   :  { %627 = vrsqrt.f32 %v478_v40  ;;  %vm481_vm2 = vcmp.eq.f32.partialorder %v478_v40, inf  ;;  %v484_v43 = vand.u32 2147483648, %v478_v40  ;;  %vm483_vm3 = vcmp.eq.f32.partialorder %v478_v40, 0.0 }
 0x21a   :  { %v628_v41 = vpop.eup %627 }
 0x21b   :  { %v480_v42 = vmul.f32 %v628_v41, %v478_v40 }
 0x21d   :  { %v482_v44 = vsel %vm481_vm2, %v478_v40, %v480_v42 }
 0x21e   :  { %v485_v45 = vsel %vm483_vm3, %v484_v43, %v482_v44 }
 0x21f   :  { %v537_v46 = vadd.f32 -0.02, %v485_v45 }
 0x221   :  { %487 = vst [vmem:[#allocation8] sm:$0x1] %v537_v46 }
 0x222   :  { %684 = shalt.err (!%p681_p6)
}
 0x223   :  { %s685_s9 = scalar_lea.hbm %s789_s2, 16 }
 0x224   :  { %p686_p7 = scmp.ne.s32.totalorder %s789_s2, %s685_s9  ;;  %p689_p8 = scmp.lt.u32.totalorder %s685_s9, %s789_s2 }
 0x226   :  { %p691_p9 = pnand %p689_p8, %p686_p7 }
 0x228   :  { %694 = shalt.err (!%p691_p9)
}
 0x229   :  { %497 = dma.vmem_to_hbm [thread:$0]  %s495_s4, 16, %s789_s2, [#allocation5]  }
 0x22a   :  { %699 = dma.done.wait [#allocation5], 16  }
 0x22b   :  { %700 = vsyncadd [#allocation5], 4294967280 }
 0x22c   :  { %501 = vsyncpa [#allocation4], 1 }
 0x22d   :  { %502 = vsyncpa [#allocation7], 1 }
 0x22e   :  { %503 = vsyncpa [#allocation5], 1 }

</bundles_post_ra>
